<compile_context>
chip_gen: v5e
topology: v5e:2x2
jax: 0.10.0
libtpu: 0.0.40
codegen_flags: <defaults>
</compile_context>

<pallas_src>
import jax
import jax.numpy as jnp
from jax.experimental import pallas as pl
from jax.experimental.pallas import tpu as pltpu


def _make_wlp_kernel(num_layers):
    """Kernel: o = sum_l w[l] * x_l, with w already normalized (sums to 1)."""

    def kernel(w_ref, *refs):
        # refs = (x_0, ..., x_{L-1}, o)
        x_refs = refs[:num_layers]
        o_ref = refs[num_layers]
        acc = w_ref[0] * x_refs[0][...].astype(jnp.float32)
        for l in range(1, num_layers):
            acc = acc + w_ref[l] * x_refs[l][...].astype(jnp.float32)
        o_ref[...] = acc.astype(o_ref.dtype)

    return kernel


def _vmem_capacity_bytes():
    try:
        return int(pltpu.get_tpu_info().vmem_capacity_bytes)
    except Exception:
        return 64 * 1024 * 1024  # conservative fallback (v7x physical VMEM/TC)


def _choose_tile_m(m_total, hidden, num_layers, itemsize, vmem_budget_bytes):
    # Pallas double-buffers every BlockSpec input and the output.
    bytes_per_row = hidden * 2 * (num_layers + 1) * itemsize
    max_rows = max(8, vmem_budget_bytes // max(1, bytes_per_row))
    tile_m = min((max_rows // 8) * 8, 2048)
    tile_m = max(tile_m, 8)
    if m_total <= tile_m:
        return m_total  # one full block (full-extent block is always legal)
    return tile_m


def weighted_layer_pooling(ft_all_layers, layer_weights, layer_start=4):
    """ft_all_layers: list/tuple of (B, S, H) arrays, len = num_hidden_layers + 1.
    layer_weights  : (num_hidden_layers + 1 - layer_start,) float32.
    Returns (B, S, H) weighted average over layers [layer_start:].
    """
    layers = list(ft_all_layers[layer_start:])   # Python slice: no data movement
    L = len(layers)
    assert layer_weights.shape == (L,)
    B, S, H = layers[0].shape
    M = B * S
    out_dtype = layers[0].dtype

    # Normalize weights host/wrapper-side: removes the in-kernel weight-sum
    # loop and the per-tile divide entirely.
    w = layer_weights.astype(jnp.float32)
    w = w / jnp.sum(w)

    # Flatten tokens: (B, S, H) -> (B*S, H). Free reshape for contiguous arrays.
    layers_flat = [x.reshape(M, H) for x in layers]

    itemsize = jnp.dtype(out_dtype).itemsize
    vmem_cap = _vmem_capacity_bytes()
    tile_m = _choose_tile_m(M, H, L, itemsize, int(0.55 * vmem_cap))
    num_tiles = pl.cdiv(M, tile_m)

    kernel = _make_wlp_kernel(L)

    grid_spec = pltpu.PrefetchScalarGridSpec(
        num_scalar_prefetch=1,                       # weights -> SMEM
        grid=(num_tiles,),                           # single parallel token axis
        in_specs=[
            pl.BlockSpec((tile_m, H), lambda i, w_ref: (i, 0))
            for _ in range(L)
        ],
        out_specs=pl.BlockSpec((tile_m, H), lambda i, w_ref: (i, 0)),
    )

    out_flat = pl.pallas_call(
        kernel,
        out_shape=jax.ShapeDtypeStruct((M, H), out_dtype),
        grid_spec=grid_spec,
        compiler_params=pltpu.CompilerParams(
            dimension_semantics=("parallel",),
            vmem_limit_bytes=int(0.85 * vmem_cap),
        ),
    )(w, *layers_flat)

    return out_flat.reshape(B, S, H)


if __name__ == "__main__":
    # Module config (small, deterministic)
    num_hidden_layers = 12
    layer_start = 4
    B, S, H = 2, 8, 32

    key = jax.random.PRNGKey(0)
    keys = jax.random.split(key, num_hidden_layers + 1)
    ft_all_layers = [
        jax.random.normal(k, (B, S, H), dtype=jnp.float32) for k in keys
    ]

    # Parameter init: same as nn.Parameter(torch.tensor([1]*(L), dtype=float))
    layer_weights = jnp.ones((num_hidden_layers + 1 - layer_start,), jnp.float32)

    out = weighted_layer_pooling(ft_all_layers, layer_weights, layer_start)
    out = jax.block_until_ready(out)

    # Pure-JAX reference
    stacked = jnp.stack(ft_all_layers)[layer_start:]
    wf = layer_weights[:, None, None, None]
    ref = (wf * stacked).sum(axis=0) / layer_weights.sum()

    assert out.shape == (B, S, H)
    assert jnp.allclose(out, ref, atol=1e-5, rtol=1e-5)
    print("KERNEL_OK")
</pallas_src>

<mosaic_0001>
module attributes {stable_mosaic.version = 11 : i64} {
  func.func @kernel(%arg0: i32, %arg1: memref<9xf32, #tpu.memory_space<smem>>, %arg2: memref<16x32xf32, #tpu.memory_space<vmem>>, %arg3: memref<16x32xf32, #tpu.memory_space<vmem>>, %arg4: memref<16x32xf32, #tpu.memory_space<vmem>>, %arg5: memref<16x32xf32, #tpu.memory_space<vmem>>, %arg6: memref<16x32xf32, #tpu.memory_space<vmem>>, %arg7: memref<16x32xf32, #tpu.memory_space<vmem>>, %arg8: memref<16x32xf32, #tpu.memory_space<vmem>>, %arg9: memref<16x32xf32, #tpu.memory_space<vmem>>, %arg10: memref<16x32xf32, #tpu.memory_space<vmem>>, %arg11: memref<16x32xf32, #tpu.memory_space<vmem>>) attributes {dimension_semantics = [#tpu.dimension_semantics<parallel>], iteration_bounds = array<i64: 1>, scalar_prefetch = 1 : i64, scratch_operands = 0 : i64, tpu.core_type = #tpu.core_type<tc>, window_params = [{transform_indices = @transform_0, window_bounds = array<i64: 16, 32>}, {transform_indices = @transform_1, window_bounds = array<i64: 16, 32>}, {transform_indices = @transform_2, window_bounds = array<i64: 16, 32>}, {transform_indices = @transform_3, window_bounds = array<i64: 16, 32>}, {transform_indices = @transform_4, window_bounds = array<i64: 16, 32>}, {transform_indices = @transform_5, window_bounds = array<i64: 16, 32>}, {transform_indices = @transform_6, window_bounds = array<i64: 16, 32>}, {transform_indices = @transform_7, window_bounds = array<i64: 16, 32>}, {transform_indices = @transform_8, window_bounds = array<i64: 16, 32>}, {transform_indices = @transform_9, window_bounds = array<i64: 16, 32>}]} {
    %c0 = arith.constant 0 : index
    %0 = memref.load %arg1[%c0] : memref<9xf32, #tpu.memory_space<smem>>
    %c0_0 = arith.constant 0 : index
    %c0_1 = arith.constant 0 : index
    %1 = vector.load %arg2[%c0_0, %c0_1] : memref<16x32xf32, #tpu.memory_space<vmem>>, vector<16x32xf32>
    %2 = vector.broadcast %0 : f32 to vector<16x32xf32>
    %3 = arith.mulf %2, %1 : vector<16x32xf32>
    %c1 = arith.constant 1 : index
    %4 = memref.load %arg1[%c1] : memref<9xf32, #tpu.memory_space<smem>>
    %c0_2 = arith.constant 0 : index
    %c0_3 = arith.constant 0 : index
    %5 = vector.load %arg3[%c0_2, %c0_3] : memref<16x32xf32, #tpu.memory_space<vmem>>, vector<16x32xf32>
    %6 = vector.broadcast %4 : f32 to vector<16x32xf32>
    %7 = arith.mulf %6, %5 : vector<16x32xf32>
    %8 = arith.addf %3, %7 : vector<16x32xf32>
    %c2 = arith.constant 2 : index
    %9 = memref.load %arg1[%c2] : memref<9xf32, #tpu.memory_space<smem>>
    %c0_4 = arith.constant 0 : index
    %c0_5 = arith.constant 0 : index
    %10 = vector.load %arg4[%c0_4, %c0_5] : memref<16x32xf32, #tpu.memory_space<vmem>>, vector<16x32xf32>
    %11 = vector.broadcast %9 : f32 to vector<16x32xf32>
    %12 = arith.mulf %11, %10 : vector<16x32xf32>
    %13 = arith.addf %8, %12 : vector<16x32xf32>
    %c3 = arith.constant 3 : index
    %14 = memref.load %arg1[%c3] : memref<9xf32, #tpu.memory_space<smem>>
    %c0_6 = arith.constant 0 : index
    %c0_7 = arith.constant 0 : index
    %15 = vector.load %arg5[%c0_6, %c0_7] : memref<16x32xf32, #tpu.memory_space<vmem>>, vector<16x32xf32>
    %16 = vector.broadcast %14 : f32 to vector<16x32xf32>
    %17 = arith.mulf %16, %15 : vector<16x32xf32>
    %18 = arith.addf %13, %17 : vector<16x32xf32>
    %c4 = arith.constant 4 : index
    %19 = memref.load %arg1[%c4] : memref<9xf32, #tpu.memory_space<smem>>
    %c0_8 = arith.constant 0 : index
    %c0_9 = arith.constant 0 : index
    %20 = vector.load %arg6[%c0_8, %c0_9] : memref<16x32xf32, #tpu.memory_space<vmem>>, vector<16x32xf32>
    %21 = vector.broadcast %19 : f32 to vector<16x32xf32>
    %22 = arith.mulf %21, %20 : vector<16x32xf32>
    %23 = arith.addf %18, %22 : vector<16x32xf32>
    %c5 = arith.constant 5 : index
    %24 = memref.load %arg1[%c5] : memref<9xf32, #tpu.memory_space<smem>>
    %c0_10 = arith.constant 0 : index
    %c0_11 = arith.constant 0 : index
    %25 = vector.load %arg7[%c0_10, %c0_11] : memref<16x32xf32, #tpu.memory_space<vmem>>, vector<16x32xf32>
    %26 = vector.broadcast %24 : f32 to vector<16x32xf32>
    %27 = arith.mulf %26, %25 : vector<16x32xf32>
    %28 = arith.addf %23, %27 : vector<16x32xf32>
    %c6 = arith.constant 6 : index
    %29 = memref.load %arg1[%c6] : memref<9xf32, #tpu.memory_space<smem>>
    %c0_12 = arith.constant 0 : index
    %c0_13 = arith.constant 0 : index
    %30 = vector.load %arg8[%c0_12, %c0_13] : memref<16x32xf32, #tpu.memory_space<vmem>>, vector<16x32xf32>
    %31 = vector.broadcast %29 : f32 to vector<16x32xf32>
    %32 = arith.mulf %31, %30 : vector<16x32xf32>
    %33 = arith.addf %28, %32 : vector<16x32xf32>
    %c7 = arith.constant 7 : index
    %34 = memref.load %arg1[%c7] : memref<9xf32, #tpu.memory_space<smem>>
    %c0_14 = arith.constant 0 : index
    %c0_15 = arith.constant 0 : index
    %35 = vector.load %arg9[%c0_14, %c0_15] : memref<16x32xf32, #tpu.memory_space<vmem>>, vector<16x32xf32>
    %36 = vector.broadcast %34 : f32 to vector<16x32xf32>
    %37 = arith.mulf %36, %35 : vector<16x32xf32>
    %38 = arith.addf %33, %37 : vector<16x32xf32>
    %c8 = arith.constant 8 : index
    %39 = memref.load %arg1[%c8] : memref<9xf32, #tpu.memory_space<smem>>
    %c0_16 = arith.constant 0 : index
    %c0_17 = arith.constant 0 : index
    %40 = vector.load %arg10[%c0_16, %c0_17] : memref<16x32xf32, #tpu.memory_space<vmem>>, vector<16x32xf32>
    %41 = vector.broadcast %39 : f32 to vector<16x32xf32>
    %42 = arith.mulf %41, %40 : vector<16x32xf32>
    %43 = arith.addf %38, %42 : vector<16x32xf32>
    %c0_18 = arith.constant 0 : index
    %c0_19 = arith.constant 0 : index
    %44 = vector.load %arg11[%c0_18, %c0_19] : memref<16x32xf32, #tpu.memory_space<vmem>>, vector<16x32xf32>
    tpu.vector_store %arg11[%c0_18, %c0_19], %43 {strides = array<i32>} : memref<16x32xf32, #tpu.memory_space<vmem>>, vector<16x32xf32>,
    return
  }
  func.func @transform_0(%arg0: i32, %arg1: memref<9xf32, #tpu.memory_space<smem>>) -> (i32, i32) {
    %c0_i32 = arith.constant 0 : i32
    %c0_i32_0 = arith.constant 0 : i32
    return %arg0, %c0_i32 : i32, i32
  }
  func.func @transform_1(%arg0: i32, %arg1: memref<9xf32, #tpu.memory_space<smem>>) -> (i32, i32) {
    %c0_i32 = arith.constant 0 : i32
    %c0_i32_0 = arith.constant 0 : i32
    return %arg0, %c0_i32 : i32, i32
  }
  func.func @transform_2(%arg0: i32, %arg1: memref<9xf32, #tpu.memory_space<smem>>) -> (i32, i32) {
    %c0_i32 = arith.constant 0 : i32
    %c0_i32_0 = arith.constant 0 : i32
    return %arg0, %c0_i32 : i32, i32
  }
  func.func @transform_3(%arg0: i32, %arg1: memref<9xf32, #tpu.memory_space<smem>>) -> (i32, i32) {
    %c0_i32 = arith.constant 0 : i32
    %c0_i32_0 = arith.constant 0 : i32
    return %arg0, %c0_i32 : i32, i32
  }
  func.func @transform_4(%arg0: i32, %arg1: memref<9xf32, #tpu.memory_space<smem>>) -> (i32, i32) {
    %c0_i32 = arith.constant 0 : i32
    %c0_i32_0 = arith.constant 0 : i32
    return %arg0, %c0_i32 : i32, i32
  }
  func.func @transform_5(%arg0: i32, %arg1: memref<9xf32, #tpu.memory_space<smem>>) -> (i32, i32) {
    %c0_i32 = arith.constant 0 : i32
    %c0_i32_0 = arith.constant 0 : i32
    return %arg0, %c0_i32 : i32, i32
  }
  func.func @transform_6(%arg0: i32, %arg1: memref<9xf32, #tpu.memory_space<smem>>) -> (i32, i32) {
    %c0_i32 = arith.constant 0 : i32
    %c0_i32_0 = arith.constant 0 : i32
    return %arg0, %c0_i32 : i32, i32
  }
  func.func @transform_7(%arg0: i32, %arg1: memref<9xf32, #tpu.memory_space<smem>>) -> (i32, i32) {
    %c0_i32 = arith.constant 0 : i32
    %c0_i32_0 = arith.constant 0 : i32
    return %arg0, %c0_i32 : i32, i32
  }
  func.func @transform_8(%arg0: i32, %arg1: memref<9xf32, #tpu.memory_space<smem>>) -> (i32, i32) {
    %c0_i32 = arith.constant 0 : i32
    %c0_i32_0 = arith.constant 0 : i32
    return %arg0, %c0_i32 : i32, i32
  }
  func.func @transform_9(%arg0: i32, %arg1: memref<9xf32, #tpu.memory_space<smem>>) -> (i32, i32) {
    %c0_i32 = arith.constant 0 : i32
    %c0_i32_0 = arith.constant 0 : i32
    return %arg0, %c0_i32 : i32, i32
  }
}

</mosaic_0001>

<bundles_post_ra>
// kernel: tpu_custom_call.1
= control target key start
LH: loop header
LB: loop body
LE: loop exit
PB: predicated region body
PF: predicated region fallthrough
CT: control target
= control target key end

     0   :  { %s565_s16 = smov [#allocation3]   ;;  %s717_s0 = inlined_call_operand.hbm [shape: f32[9], index: 0, kind: input, shape index: {}]   ;;  %s718_s1 = inlined_call_operand.hbm [shape: f32[16,32], index: 1, kind: input, shape index: {}]   ;;  %s719_s2 = inlined_call_operand.hbm [shape: f32[16,32], index: 2, kind: input, shape index: {}]   ;;  %s720_s3 = inlined_call_operand.hbm [shape: f32[16,32], index: 3, kind: input, shape index: {}]   ;;  %s721_s4 = inlined_call_operand.hbm [shape: f32[16,32], index: 4, kind: input, shape index: {}]   ;;  %s722_s5 = inlined_call_operand.hbm [shape: f32[16,32], index: 5, kind: input, shape index: {}]   ;;  %s723_s6 = inlined_call_operand.hbm [shape: f32[16,32], index: 6, kind: input, shape index: {}]   ;;  %s724_s7 = inlined_call_operand.hbm [shape: f32[16,32], index: 7, kind: input, shape index: {}]   ;;  %s725_s8 = inlined_call_operand.hbm [shape: f32[16,32], index: 8, kind: input, shape index: {}]   ;;  %s726_s9 = inlined_call_operand.hbm [shape: f32[16,32], index: 9, kind: input, shape index: {}]   ;;  %s727_s10 = inlined_call_operand.hbm [shape: f32[16,32], index: 10, kind: output, shape index: {}]  }
   0x1   :  { %s16_s15 = sshll.u32 %s717_s0, 4  ;;  %s17_s15 = int_to_ptr.hbm [resolvable:$true] %s16_s15 }
   0x2   :  { %19 = dma.hbm_to_smem %s17_s15, 16, %s565_s16, [#allocation2] }
   0x3   :  { %551 = dma.done.wait [#allocation2], 16 }
   0x4   :  { %552 = vsyncadd [#allocation2], 4294967280 }
   0x5   :  { %22 = sfence }
   0x6   :  { %23 = vsyncpa [#allocation5], 0 }
   0x7   :  { %24 = vsyncpa [#allocation8], 0 }
   0x8   :  { %25 = vsyncpa [#allocation11], 0 }
   0x9   :  { %26 = vsyncpa [#allocation14], 0 }
   0xa   :  { %27 = vsyncpa [#allocation17], 0 }
   0xb   :  { %28 = vsyncpa [#allocation6], 0  ;;  %s46_s19 = sshll.u32 %s719_s2, 4  ;;  %s566_s20 = smov [#allocation7]   ;;  %s47_s19 = int_to_ptr.hbm [resolvable:$true] %s46_s19 }
   0xc   :  { %s48_s21 = sshll.u32 %s566_s20, 4  ;;  %s72_s23 = sshll.u32 %s721_s4, 4  ;;  %s49_s21 = int_to_ptr.vmem [resolvable:$true] %s48_s21  ;;  %s73_s23 = int_to_ptr.hbm [resolvable:$true] %s72_s23 }
   0xd   :  { %s567_s24 = smov 128   ;;  %s568_s25 = smov 8  }
   0xe   :  { %54 = dma.hbm_to_vmem [thread:$0]  %s47_s19, 256, %s49_s21, [#allocation8], %s567_s24, %s567_s24, %s568_s25  }
   0xf   :  { %s569_s26 = smov [#allocation10]   ;;  %s98_s2 = sshll.u32 %s723_s6, 4  ;;  %s99_s2 = int_to_ptr.hbm [resolvable:$true] %s98_s2 }
  0x10   :  { %s74_s27 = sshll.u32 %s569_s26, 4  ;;  %s124_s11 = sshll.u32 %s725_s8, 4  ;;  %s75_s27 = int_to_ptr.vmem [resolvable:$true] %s74_s27  ;;  %s125_s11 = int_to_ptr.hbm [resolvable:$true] %s124_s11 }
  0x11   :  { %80 = dma.hbm_to_vmem [thread:$0]  %s73_s23, 256, %s75_s27, [#allocation11], %s567_s24, %s567_s24, %s568_s25  }
  0x12   :  { %s570_s12 = smov [#allocation13]   ;;  %s571_s14 = smov [#allocation16]  }
  0x13   :  { %s100_s13 = sshll.u32 %s570_s12, 4  ;;  %s126_s6 = sshll.u32 %s571_s14, 4  ;;  %s101_s13 = int_to_ptr.vmem [resolvable:$true] %s100_s13  ;;  %s127_s6 = int_to_ptr.vmem [resolvable:$true] %s126_s6 }
  0x14   :  { %106 = dma.hbm_to_vmem [thread:$0]  %s99_s2, 256, %s101_s13, [#allocation14], %s567_s24, %s567_s24, %s568_s25  }
  0x15   :  { %s33_s17 = sshll.u32 %s718_s1, 4  ;;  %s59_s19 = sshll.u32 %s720_s3, 4  ;;  %s34_s17 = int_to_ptr.hbm [resolvable:$true] %s33_s17  ;;  %s60_s19 = int_to_ptr.hbm [resolvable:$true] %s59_s19 }
  0x16   :  { %132 = dma.hbm_to_vmem [thread:$0]  %s125_s11, 256, %s127_s6, [#allocation17], %s567_s24, %s567_s24, %s568_s25  }
  0x17   :  { %s572_s20 = smov [#allocation4]   ;;  %s573_s0 = smov [#allocation9]  }
  0x18   :  { %s35_s21 = sshll.u32 %s572_s20, 4  ;;  %s61_s1 = sshll.u32 %s573_s0, 4  ;;  %s36_s21 = int_to_ptr.vmem [resolvable:$true] %s35_s21  ;;  %s62_s1 = int_to_ptr.vmem [resolvable:$true] %s61_s1 }
  0x19   :  { %41 = dma.hbm_to_vmem [thread:$0]  %s34_s17, 256, %s36_s21, [#allocation5], %s567_s24, %s567_s24, %s568_s25  }
  0x1a   :  { %s85_s26 = sshll.u32 %s722_s5, 4  ;;  %s111_s28 = sshll.u32 %s724_s7, 4  ;;  %s86_s26 = int_to_ptr.hbm [resolvable:$true] %s85_s26  ;;  %s112_s28 = int_to_ptr.hbm [resolvable:$true] %s111_s28 }
  0x1b   :  { %67 = dma.hbm_to_vmem [thread:$0]  %s60_s19, 256, %s62_s1, [#allocation8], %s567_s24, %s567_s24, %s568_s25  }
  0x1c   :  { %s574_s29 = smov [#allocation12]   ;;  %s575_s4 = smov [#allocation15]  }
  0x1d   :  { %s87_s2 = sshll.u32 %s574_s29, 4  ;;  %s113_s5 = sshll.u32 %s575_s4, 4  ;;  %s88_s2 = int_to_ptr.vmem [resolvable:$true] %s87_s2  ;;  %s114_s5 = int_to_ptr.vmem [resolvable:$true] %s113_s5 }
  0x1e   :  { %93 = dma.hbm_to_vmem [thread:$0]  %s86_s26, 256, %s88_s2, [#allocation11], %s567_s24, %s567_s24, %s568_s25  }
  0x1f   :  { %s137_s12 = sshll.u32 %s726_s9, 4  ;;  %s576_s7 = smov [#allocation18]   ;;  %s138_s12 = int_to_ptr.hbm [resolvable:$true] %s137_s12 }
  0x20   :  { %119 = dma.hbm_to_vmem [thread:$0]  %s112_s28, 256, %s114_s5, [#allocation14], %s567_s24, %s567_s24, %s568_s25  }
  0x21   :  { %s139_s13 = sshll.u32 %s576_s7, 4  ;;  %s140_s13 = int_to_ptr.vmem [resolvable:$true] %s139_s13 }
  0x22   :  { %145 = dma.hbm_to_vmem [thread:$0]  %s138_s12, 256, %s140_s13, [#allocation17], %s567_s24, %s567_s24, %s568_s25  }
  0x23   :  { %553 = dma.done.wait [#allocation5], 256  }
  0x24   :  { %554 = vsyncadd [#allocation5], 4294967040 }
  0x25   :  { %555 = dma.done.wait [#allocation8], 512  }
  0x26   :  { %556 = vsyncadd [#allocation8], 4294966784 }
  0x27   :  { %557 = dma.done.wait [#allocation11], 512  }
  0x28   :  { %558 = vsyncadd [#allocation11], 4294966784 }
  0x29   :  { %559 = dma.done.wait [#allocation14], 512  }
  0x2a   :  { %560 = vsyncadd [#allocation14], 4294966784 }
  0x2b   :  { %561 = dma.done.wait [#allocation17], 512  }
  0x2c   :  { %562 = vsyncadd [#allocation17], 4294966784  ;;  %s182_s9 = sld [smem:[#allocation3]]  ;;  %v183_v0 = vld [vmem:[#allocation4] sm:$0xff]  ;;  %v189_v2 = vld [vmem:[#allocation7] sm:$0xff]  ;;  %vm252_vm0 = vcmask 261120  }
  0x2d   :  { %s690_s14 = sld [smem:[#allocation3 + $0x1]]  ;;  %v197_v3 = vld [vmem:[#allocation9] sm:$0xff]  ;;  %v205_v6 = vld [vmem:[#allocation10] sm:$0xff]  ;;  %v184_v12 = vld [vmem:[#allocation4 + $0x8] sm:$0xff]  ;;  %s577_s20 = smov [#allocation19]  }
  0x2e   :  { %s279_s6 = sld [smem:[#allocation3 + $0x2]]  ;;  %v213_v9 = vld [vmem:[#allocation12] sm:$0xff]  ;;  %v190_v13 = vld [vmem:[#allocation7 + $0x8] sm:$0xff]  ;;  %v198_v14 = vld [vmem:[#allocation9 + $0x8] sm:$0xff]  ;;  %s259_s21 = sshll.u32 %s577_s20, 4  ;;  %s260_s21 = int_to_ptr.vmem [resolvable:$true] %s259_s21 }
  0x2f   :  { %s692_s15 = sld [smem:[#allocation3 + $0x3]]  ;;  %v206_v19 = vld [vmem:[#allocation10 + $0x8] sm:$0xff]  ;;  %v221_v20 = vld [vmem:[#allocation13] sm:$0xff]  ;;  %v214_v26 = vld [vmem:[#allocation12 + $0x8] sm:$0xff]  ;;  %s261_s22 = sshll.u32 %s727_s10, 4  ;;  %s262_s22 = int_to_ptr.hbm [resolvable:$true] %s261_s22 }
  0x30   :  { %s694_s16 = sld [smem:[#allocation3 + $0x4]]  ;;  %v229_v27 = vld [vmem:[#allocation15] sm:$0xff]  ;;  %v222_v33 = vld [vmem:[#allocation13 + $0x8] sm:$0xff]  ;;  %v237_v34 = vld [vmem:[#allocation16] sm:$0xff] }
  0x31   :  { %s696_s17 = sld [smem:[#allocation3 + $0x5]]  ;;  %v230_v40 = vld [vmem:[#allocation15 + $0x8] sm:$0xff]  ;;  %v245_v41 = vld [vmem:[#allocation18] sm:$0xff]  ;;  %v238_v47 = vld [vmem:[#allocation16 + $0x8] sm:$0xff] }
  0x32   :  { %v185_v1 = vstv %s182_s9  ;;  %s698_s8 = sld [smem:[#allocation3 + $0x6]]  ;;  %v246_v52 = vld [vmem:[#allocation18 + $0x8] sm:$0xff] }
  0x33   :  { %v186_v4 = vmul.f32 %v185_v1, %v183_v0  ;;  %v191_v5 = vstv %s690_s14  ;;  %s701_s18 = sld [smem:[#allocation3 + $0x7]]  ;;  %v187_v18 = vmul.f32 %v185_v1, %v184_v12 }
  0x34   :  { %v192_v7 = vmul.f32 %v191_v5, %v189_v2  ;;  %v199_v8 = vstv %s279_s6  ;;  %s704_s19 = sld [smem:[#allocation3 + $0x8]]  ;;  %v193_v22 = vmul.f32 %v191_v5, %v190_v13 }
  0x35   :  { %v200_v10 = vmul.f32 %v199_v8, %v197_v3  ;;  %v207_v11 = vstv %s692_s15  ;;  %v201_v23 = vmul.f32 %v199_v8, %v198_v14 }
  0x36   :  { %v194_v15 = vadd.f32 %v192_v7, %v186_v4  ;;  %v208_v16 = vmul.f32 %v207_v11, %v205_v6  ;;  %v215_v17 = vstv %s694_s16  ;;  %v195_v29 = vadd.f32 %v193_v22, %v187_v18 }
  0x37   :  { %v223_v21 = vstv %s696_s17  ;;  %v216_v25 = vmul.f32 %v215_v17, %v213_v9  ;;  %v209_v30 = vmul.f32 %v207_v11, %v206_v19  ;;  %v217_v37 = vmul.f32 %v215_v17, %v214_v26 }
  0x38   :  { %v202_v24 = vadd.f32 %v200_v10, %v194_v15  ;;  %v231_v28 = vstv %s698_s8  ;;  %v224_v32 = vmul.f32 %v223_v21, %v221_v20  ;;  %v203_v36 = vadd.f32 %v201_v23, %v195_v29 }
  0x39   :  { %v239_v35 = vstv %s701_s18  ;;  %v232_v39 = vmul.f32 %v231_v28, %v229_v27  ;;  %v225_v44 = vmul.f32 %v223_v21, %v222_v33  ;;  %v233_v49 = vmul.f32 %v231_v28, %v230_v40 }
  0x3a   :  { %v210_v31 = vadd.f32 %v208_v16, %v202_v24  ;;  %v247_v42 = vstv %s704_s19  ;;  %v211_v43 = vadd.f32 %v209_v30, %v203_v36  ;;  %v240_v46 = vmul.f32 %v239_v35, %v237_v34 }
  0x3b   :  { %v248_v51 = vmul.f32 %v247_v42, %v245_v41  ;;  %v241_v54 = vmul.f32 %v239_v35, %v238_v47  ;;  %v249_v57 = vmul.f32 %v247_v42, %v246_v52 }
  0x3c   :  { %v218_v38 = vadd.f32 %v216_v25, %v210_v31  ;;  %v219_v48 = vadd.f32 %v217_v37, %v211_v43 }
  0x3e   :  { %v226_v45 = vadd.f32 %v224_v32, %v218_v38  ;;  %v227_v53 = vadd.f32 %v225_v44, %v219_v48 }
  0x40   :  { %v234_v50 = vadd.f32 %v232_v39, %v226_v45  ;;  %v235_v56 = vadd.f32 %v233_v49, %v227_v53 }
  0x42   :  { %v242_v55 = vadd.f32 %v240_v46, %v234_v50  ;;  %v243_v59 = vadd.f32 %v241_v54, %v235_v56 }
  0x44   :  { %v250_v58 = vadd.f32 %v248_v51, %v242_v55  ;;  %v251_v60 = vadd.f32 %v249_v57, %v243_v59 }
  0x46   :  { %253 = vst.msk [vmem:[#allocation19] sm:$0xff] %vm252_vm0, %v250_v58 }
  0x47   :  { %254 = vst.msk [vmem:[#allocation19 + $0x8] sm:$0xff] %vm252_vm0, %v251_v60 }
  0x48   :  { %267 = dma.vmem_to_hbm [thread:$0]  %s260_s21, 256, %s262_s22, [#allocation6], %s567_s24, %s567_s24, %s568_s25  }
  0x49   :  { %563 = dma.done.wait [#allocation6], 256  }
  0x4a   :  { %564 = vsyncadd [#allocation6], 4294967040 }
  0x4b   :  { %272 = vsyncpa [#allocation5], 1 }
  0x4c   :  { %273 = vsyncpa [#allocation8], 1 }
  0x4d   :  { %274 = vsyncpa [#allocation11], 1 }
  0x4e   :  { %275 = vsyncpa [#allocation14], 1 }
  0x4f   :  { %276 = vsyncpa [#allocation17], 1 }
  0x50   :  { %277 = vsyncpa [#allocation6], 1 }

</bundles_post_ra>
